<compile_context>
chip_gen: v6e
topology: v6e:2x2x1
jax: 0.10.0
libtpu: 0.0.40
codegen_flags: <defaults>
</compile_context>

<pallas_src>
import functools
from typing import NamedTuple

import jax
import jax.numpy as jnp
import numpy as np
from jax import lax
from jax.experimental import pallas as pl
from jax.experimental.pallas import tpu as pltpu


def se_kernel(x_ref, w1_ref, w2_ref, o_ref):
    """One batch-block of squeeze-excitation.

    x_ref / o_ref : (B_TILE, C//2, 2*HW) io dtype (f32 or bf16).  Channel pair
                    (2p, 2p+1) is packed on the lane axis: lanes [0, HW) hold
                    channel 2p, lanes [HW, 2*HW) hold channel 2p+1.
    w1_ref : (C, Cr)  f32 -- W1^T with rows in packed order [even ch | odd ch]
    w2_ref : (Cr, C)  f32 -- W2^T with cols in packed order [even ch | odd ch]
    """
    x = x_ref[...].astype(jnp.float32)                       # (B, C2, L)
    _, c2, L = x.shape
    hw = L // 2
    inv_hw = 1.0 / hw

    # Lane-parity mask built once on a single (1, 1, L) row; the `where`s
    # broadcast it (no full-block int32 iota / compare).
    lane = lax.broadcasted_iota(jnp.int32, (1, 1, L), dimension=2)
    is_even = lane < hw

    # --- Squeeze: global average pool per channel.  One full-block select +
    # two lane reductions; the odd half falls out by subtraction. ---
    sum_all = jnp.sum(x, axis=-1)                                          # (B, C2)
    pooled_even = jnp.sum(jnp.where(is_even, x, 0.0), axis=-1) * inv_hw    # ch 0,2,4,...
    pooled_odd = sum_all * inv_hw - pooled_even                            # ch 1,3,5,...
    pooled = jnp.concatenate([pooled_even, pooled_odd], axis=-1)           # (B, C) packed

    # --- Excitation MLP: one matmul per layer (merged even/odd weights). ---
    h = jnp.maximum(
        jnp.dot(pooled, w1_ref[...], preferred_element_type=jnp.float32), 0.0)  # (B, Cr)
    s = jax.nn.sigmoid(
        jnp.dot(h, w2_ref[...], preferred_element_type=jnp.float32))            # (B, C)
    s_even = s[:, :c2]
    s_odd = s[:, c2:]

    # --- Excite: broadcast the per-channel gate over the packed lane layout. ---
    scale = jnp.where(is_even, s_even[:, :, None], s_odd[:, :, None])      # (B, C2, L)
    # Re-read x from VMEM for the store path instead of keeping the whole block
    # live in vregs across the squeeze chain (vld slots are cheap, vregs are not).
    o_ref[...] = (x_ref[...].astype(jnp.float32) * scale).astype(o_ref.dtype)


def _vmem_capacity_bytes() -> int:
    """Physical VMEM per TensorCore, with a v7x-safe fallback."""
    try:
        return int(pltpu.get_tpu_info().vmem_capacity_bytes)
    except Exception:
        return 64 * 1024 * 1024


def _is_dual_tensorcore_chip() -> bool:
    """True on chips with 2 TensorCores per chip (v7x)."""
    try:
        kind = jax.devices()[0].device_kind.lower()
    except Exception:
        return False
    return ("v7" in kind) or ("7x" in kind)


class _SEConfig(NamedTuple):
    batch_tile: int
    vmem_limit_bytes: int


def _se_config(n: int, bytes_per_sample: int) -> _SEConfig:
    dual_tc = _is_dual_tensorcore_chip()
    vmem_cap = _vmem_capacity_bytes()
    # Scoped-VMEM limit: generous on single-TC chips (128 MiB physical),
    # clamped to 48 MiB per core on v7x (64 MiB/TC physical).
    cap = (48 if dual_tc else 64) * 1024 * 1024
    vmem_limit = min(vmem_cap * 3 // 4, cap)
    # Budget for the 4 pipelined x blocks (2 in + 2 out, double-buffered),
    # leaving ~25% headroom for weights / compiler scratch.
    budget = (vmem_limit * 3) // 4
    max_b = max(1, budget // (4 * bytes_per_sample))
    bt = min(n, max_b)
    # Only force >= 2 grid steps on dual-TensorCore chips so the "parallel"
    # grid axis can be sharded across both cores; on single-TC chips (v5e/v6e)
    # one bigger block per step is strictly better (per-step overhead ~0.35us).
    if dual_tc and n > 1:
        bt = min(bt, max(1, n // 2))
    while n % bt:
        bt -= 1
    return _SEConfig(batch_tile=bt, vmem_limit_bytes=vmem_limit)


@functools.partial(jax.jit, static_argnums=(3,), donate_argnums=(0,))
def _se_pallas_call(x, w1, w2, cfg: _SEConfig):
    N, C, H, W = x.shape
    Cr = w1.shape[0]
    HW = H * W
    C2 = C // 2
    L = 2 * HW                      # lane width of the packed layout (128 for 8x8)

    # Wrapper-side layout plumbing (free): pack channel pairs onto the lane axis.
    x_packed = x.reshape(N, C2, L)
    # Merged excitation weights in the packed [even | odd] channel order.
    w1m = jnp.concatenate([w1[:, 0::2], w1[:, 1::2]], axis=1).T.astype(jnp.float32)  # (C, Cr)
    w2m = jnp.concatenate([w2[0::2, :], w2[1::2, :]], axis=0).T.astype(jnp.float32)  # (Cr, C)

    bt = cfg.batch_tile
    grid = (N // bt,)
    itemsize = x.dtype.itemsize
    cost = pl.CostEstimate(
        flops=2 * N * C * Cr * 2 + 3 * N * C * HW,
        transcendentals=N * C,
        bytes_accessed=2 * N * C * HW * itemsize + 4 * (w1m.size + w2m.size),
    )

    out_packed = pl.pallas_call(
        se_kernel,
        out_shape=jax.ShapeDtypeStruct((N, C2, L), x.dtype),
        grid_spec=pltpu.PrefetchScalarGridSpec(
            num_scalar_prefetch=0,
            grid=grid,
            in_specs=[
                pl.BlockSpec((bt, C2, L), lambda i: (i, 0, 0)),
                pl.BlockSpec((C, Cr), lambda i: (0, 0)),
                pl.BlockSpec((Cr, C), lambda i: (0, 0)),
            ],
            out_specs=pl.BlockSpec((bt, C2, L), lambda i: (i, 0, 0)),
        ),
        # In-place rescale: x is donated into the jit, so this alias is honored
        # without a defensive copy (one HBM read + one HBM write total).
        input_output_aliases={0: 0},
        compiler_params=pltpu.CompilerParams(
            dimension_semantics=("parallel",),
            vmem_limit_bytes=cfg.vmem_limit_bytes,
        ),
        cost_estimate=cost,
    )(x_packed, w1m, w2m)
    return out_packed.reshape(N, C, H, W)


def squeeze_excitation(x, w1, w2):
    """SqueezeExcitation forward.

    x: (N, C, H, W); w1: (Cr, C); w2: (C, Cr) (squeezed 1x1-conv weights).
    NOTE: x is donated (consumed) so the in-place alias is genuine; do not
    reuse the caller's x array after this call.
    """
    N, C, H, W = x.shape
    assert C % 2 == 0, "channel-pair packing needs an even channel count"
    cfg = _se_config(N, C * H * W * x.dtype.itemsize)
    return _se_pallas_call(x, w1, w2, cfg)


def reference(x, w1, w2):
    pooled = jnp.mean(x, axis=(2, 3))            # AdaptiveAvgPool2d(1)
    h = jnp.maximum(pooled @ w1.T, 0.0)          # 1x1 conv + ReLU
    s = jax.nn.sigmoid(h @ w2.T)                 # 1x1 conv + Sigmoid
    return x * s[:, :, None, None]


if __name__ == "__main__":
    # Shapes of the first SE site in UltraFastChessNet: base_filters=64 channels
    # over an 8x8 board, reduction=16.
    N, C, H, W = 2, 64, 8, 8
    reduction = 16
    Cr = C // reduction  # 4

    key = jax.random.PRNGKey(0)
    kx, k1, k2 = jax.random.split(key, 3)
    x = jax.random.normal(kx, (N, C, H, W), dtype=jnp.float32)
    # nn.Conv2d(C, Cr, 1, bias=False) weight: (Cr, C, 1, 1) -> squeezed (Cr, C)
    w1 = jax.random.normal(k1, (Cr, C), dtype=jnp.float32) * 0.1
    # nn.Conv2d(Cr, C, 1, bias=False) weight: (C, Cr, 1, 1) -> squeezed (C, Cr)
    w2 = jax.random.normal(k2, (C, Cr), dtype=jnp.float32) * 0.1

    # Reference and the bf16 copy are taken BEFORE x is donated to the kernel.
    ref = jax.block_until_ready(reference(x, w1, w2))
    x_bf16 = jax.block_until_ready(x.astype(jnp.bfloat16))

    # f32 I/O (matches the PyTorch module's numerics exactly).
    out = jax.block_until_ready(squeeze_excitation(x, w1, w2))          # donates x
    np.testing.assert_allclose(np.asarray(out), np.asarray(ref), rtol=1e-5, atol=1e-5)

    # bf16 I/O: same kernel, f32 arithmetic inside, half the HBM traffic of
    # this memory-bound op.
    out_bf16 = jax.block_until_ready(squeeze_excitation(x_bf16, w1, w2))  # donates x_bf16
    np.testing.assert_allclose(np.asarray(out_bf16.astype(jnp.float32)), np.asarray(ref),
                               rtol=2e-2, atol=2e-2)

    print("KERNEL_OK")
</pallas_src>

<mosaic_0001>
module attributes {stable_mosaic.version = 11 : i64} {
  func.func @se_kernel(%arg0: i32, %arg1: memref<2x32x128xf32, #tpu.memory_space<vmem>>, %arg2: memref<64x4xf32, #tpu.memory_space<vmem>>, %arg3: memref<4x64xf32, #tpu.memory_space<vmem>>, %arg4: memref<2x32x128xf32, #tpu.memory_space<vmem>>) attributes {dimension_semantics = [#tpu.dimension_semantics<parallel>], iteration_bounds = array<i64: 1>, scalar_prefetch = 0 : i64, scratch_operands = 0 : i64, tpu.core_type = #tpu.core_type<tc>, window_params = [{transform_indices = @transform_0, window_bounds = array<i64: 2, 32, 128>}, {pipeline_mode = #tpu.pipeline_mode<synchronous>, transform_indices = @transform_1, window_bounds = array<i64: 64, 4>}, {pipeline_mode = #tpu.pipeline_mode<synchronous>, transform_indices = @transform_2, window_bounds = array<i64: 4, 64>}, {transform_indices = @transform_3, window_bounds = array<i64: 2, 32, 128>}]} {
    %c0 = arith.constant 0 : index
    %c0_0 = arith.constant 0 : index
    %c0_1 = arith.constant 0 : index
    %0 = vector.load %arg1[%c0, %c0_0, %c0_1] : memref<2x32x128xf32, #tpu.memory_space<vmem>>, vector<2x32x128xf32>
    %1 = tpu.iota {dimensions = array<i32: 2>} : vector<1x1x128xi32>
    %c64_i32 = arith.constant 64 : i32
    %2 = vector.broadcast %c64_i32 : i32 to vector<1x1x128xi32>
    %3 = arith.cmpi slt, %1, %2 : vector<1x1x128xi32>
    %cst = arith.constant dense<0.000000e+00> : vector<2x32xf32>
    %4 = vector.multi_reduction <add>, %0, %cst [2] : vector<2x32x128xf32> to vector<2x32xf32>
    %cst_2 = arith.constant 0.000000e+00 : f32
    %5 = vector.shape_cast %3 : vector<1x1x128xi1> to vector<1x1x128xi1>
    %6 = vector.broadcast %5 : vector<1x1x128xi1> to vector<2x32x128xi1>
    %7 = vector.broadcast %cst_2 : f32 to vector<2x32x128xf32>
    %8 = arith.select %6, %0, %7 : vector<2x32x128xi1>, vector<2x32x128xf32>
    %cst_3 = arith.constant dense<0.000000e+00> : vector<2x32xf32>
    %9 = vector.multi_reduction <add>, %8, %cst_3 [2] : vector<2x32x128xf32> to vector<2x32xf32>
    %cst_4 = arith.constant 1.562500e-02 : f32
    %10 = vector.broadcast %cst_4 : f32 to vector<2x32xf32>
    %11 = arith.mulf %9, %10 : vector<2x32xf32>
    %cst_5 = arith.constant 1.562500e-02 : f32
    %12 = vector.broadcast %cst_5 : f32 to vector<2x32xf32>
    %13 = arith.mulf %4, %12 : vector<2x32xf32>
    %14 = arith.subf %13, %11 : vector<2x32xf32>
    %15 = tpu.concatenate %11, %14 in 1 : vector<2x32xf32>, vector<2x32xf32> -> vector<2x64xf32>
    %c0_6 = arith.constant 0 : index
    %c0_7 = arith.constant 0 : index
    %16 = vector.load %arg2[%c0_6, %c0_7] : memref<64x4xf32, #tpu.memory_space<vmem>>, vector<64x4xf32>
    %cst_8 = arith.constant dense<0.000000e+00> : vector<2x4xf32>
    %17 = tpu.matmul %15, %16, %cst_8 {dimension_numbers = #tpu.dot_dimension_numbers<[1], [0], [0], [1], [0, 0, 1, 1], [], []>} : vector<2x64xf32>, vector<64x4xf32>, vector<2x4xf32> -> vector<2x4xf32>
    %cst_9 = arith.constant 0.000000e+00 : f32
    %18 = vector.broadcast %cst_9 : f32 to vector<2x4xf32>
    %19 = arith.maximumf %17, %18 : vector<2x4xf32>
    %c0_10 = arith.constant 0 : index
    %c0_11 = arith.constant 0 : index
    %20 = vector.load %arg3[%c0_10, %c0_11] : memref<4x64xf32, #tpu.memory_space<vmem>>, vector<4x64xf32>
    %cst_12 = arith.constant dense<0.000000e+00> : vector<2x64xf32>
    %21 = tpu.matmul %19, %20, %cst_12 {dimension_numbers = #tpu.dot_dimension_numbers<[1], [0], [0], [1], [0, 0, 1, 1], [], []>} : vector<2x4xf32>, vector<4x64xf32>, vector<2x64xf32> -> vector<2x64xf32>
    %22 = arith.negf %21 : vector<2x64xf32>
    %23 = math.exp %22 : vector<2x64xf32>
    %cst_13 = arith.constant 1.000000e+00 : f32
    %24 = vector.broadcast %cst_13 : f32 to vector<2x64xf32>
    %25 = arith.addf %24, %23 : vector<2x64xf32>
    %26 = arith.divf %24, %25 : vector<2x64xf32>
    %27 = vector.extract_strided_slice %26 {offsets = [0, 0], sizes = [2, 32], strides = [1, 1]} : vector<2x64xf32> to vector<2x32xf32>
    %28 = vector.extract_strided_slice %26 {offsets = [0, 32], sizes = [2, 32], strides = [1, 1]} : vector<2x64xf32> to vector<2x32xf32>
    %29 = vector.shape_cast %27 : vector<2x32xf32> to vector<2x32x1xf32>
    %30 = vector.shape_cast %28 : vector<2x32xf32> to vector<2x32x1xf32>
    %31 = vector.shape_cast %3 : vector<1x1x128xi1> to vector<1x1x128xi1>
    %32 = vector.broadcast %31 : vector<1x1x128xi1> to vector<2x32x128xi1>
    %33 = vector.shape_cast %29 : vector<2x32x1xf32> to vector<2x32x1xf32>
    %34 = vector.broadcast %33 : vector<2x32x1xf32> to vector<2x32x128xf32>
    %35 = vector.shape_cast %30 : vector<2x32x1xf32> to vector<2x32x1xf32>
    %36 = vector.broadcast %35 : vector<2x32x1xf32> to vector<2x32x128xf32>
    %37 = arith.select %32, %34, %36 : vector<2x32x128xi1>, vector<2x32x128xf32>
    %c0_14 = arith.constant 0 : index
    %c0_15 = arith.constant 0 : index
    %c0_16 = arith.constant 0 : index
    %38 = vector.load %arg1[%c0_14, %c0_15, %c0_16] : memref<2x32x128xf32, #tpu.memory_space<vmem>>, vector<2x32x128xf32>
    %39 = arith.mulf %38, %37 : vector<2x32x128xf32>
    %c0_17 = arith.constant 0 : index
    %c0_18 = arith.constant 0 : index
    %c0_19 = arith.constant 0 : index
    %40 = vector.load %arg4[%c0_17, %c0_18, %c0_19] : memref<2x32x128xf32, #tpu.memory_space<vmem>>, vector<2x32x128xf32>
    tpu.vector_store %arg4[%c0_17, %c0_18, %c0_19], %39 {strides = array<i32>} : memref<2x32x128xf32, #tpu.memory_space<vmem>>, vector<2x32x128xf32>,
    return
  }
  func.func @transform_0(%arg0: i32) -> (i32, i32, i32) {
    %c0_i32 = arith.constant 0 : i32
    %c0_i32_0 = arith.constant 0 : i32
    %c0_i32_1 = arith.constant 0 : i32
    return %arg0, %c0_i32, %c0_i32_0 : i32, i32, i32
  }
  func.func @transform_1(%arg0: i32) -> (i32, i32) {
    %c0_i32 = arith.constant 0 : i32
    %c0_i32_0 = arith.constant 0 : i32
    %c0_i32_1 = arith.constant 0 : i32
    return %c0_i32, %c0_i32_0 : i32, i32
  }
  func.func @transform_2(%arg0: i32) -> (i32, i32) {
    %c0_i32 = arith.constant 0 : i32
    %c0_i32_0 = arith.constant 0 : i32
    %c0_i32_1 = arith.constant 0 : i32
    return %c0_i32, %c0_i32_0 : i32, i32
  }
  func.func @transform_3(%arg0: i32) -> (i32, i32, i32) {
    %c0_i32 = arith.constant 0 : i32
    %c0_i32_0 = arith.constant 0 : i32
    %c0_i32_1 = arith.constant 0 : i32
    return %arg0, %c0_i32, %c0_i32_0 : i32, i32, i32
  }
}

</mosaic_0001>

<bundles_post_ra>
// kernel: _se_pallas_call.1
= control target key start
LH: loop header
LB: loop body
LE: loop exit
PB: predicated region body
PF: predicated region fallthrough
CT: control target
= control target key end

     0   :  { %v22_v0 = vlaneseq  ;;  %v514_v18 = vmov 0.0   ;;  %vm515_vm1 = vmmov 0   ;;  %vm108_vm2 = vcmask 130112   ;;  %s722_s0 = inlined_call_operand.vmem [shape: f32[2,32,128], index: 0, kind: input, shape index: {}, may-alias: {0,3}]   ;;  %s723_s1 = inlined_call_operand.vmem [shape: f32[64,4], index: 1, kind: input, shape index: {}]   ;;  %s724_s2 = inlined_call_operand.vmem [shape: f32[4,64], index: 2, kind: input, shape index: {}]   ;;  %s725_s3 = inlined_call_operand.vmem [shape: f32[2,32,128], index: 3, kind: output, shape index: {}, may-alias: {0,3}]  }
   0x1   :  { %v539_v1 = vld [vmem:[%s722_s0 + $0x20] sm:$0xff]  ;;  %v554_v4 = vld [vmem:[%s722_s0 + $0x28] sm:$0xff]  ;;  %v579_v10 = vld [vmem:[%s722_s0 + $0x30] sm:$0xff]  ;;  %484 = vmatprep.subr.mxu0 %v514_v18  ;;  %503 = vmatprep.subr.mxu1 %v514_v18  ;;  %vm164_vm3 = vcmask 392512   ;;  %vm115_vm4 = vcmask 195712   ;;  %vm171_vm5 = vcmask 458112  }
   0x2   :  { %v544_v2 = vld [vmem:[%s722_s0] sm:$0xff]  ;;  %33 = vadd.xlane.f32.xlu1 %v539_v1  ;;  %v549_v3 = vand.u32 127, %v22_v0  ;;  %v559_v5 = vld [vmem:[%s722_s0 + $0x8] sm:$0xff]  ;;  %v584_v11 = vld [vmem:[%s722_s0 + $0x10] sm:$0xff]  ;;  %500 = vmatprep.mubr.msk.f32.mxu0 %vm515_vm1, %v514_v18  ;;  %v637_v35 = vshrl.u32 %v22_v0, 7  ;;  %vm122_vm6 = vcmask 261312  }
   0x3   :  { %25 = vadd.xlane.f32.xlu0 %v544_v2  ;;  %v597_v14 = vld [vmem:[%s722_s0 + $0x38] sm:$0xff]  ;;  %v209_v20 = vld [vmem:[%s723_s1 + $0x30] sm:$0xff]  ;;  %v208_v21 = vld [vmem:[%s723_s1 + $0x28] sm:$0xff]  ;;  %505 = vmatprep.mubr.msk.f32.mxu1 %vm515_vm1, %v514_v18  ;;  %vm143_vm7 = vcmask 1041409   ;;  %vm178_vm8 = vcmask 523712   ;;  %vm201_vm9 = vcmask 261120  }
   0x4   :  { %vm24_vm0 = vcmp.lt.s32.totalorder %v549_v3, 64  ;;  %v602_v15 = vld [vmem:[%s722_s0 + $0x18] sm:$0xff]  ;;  %v207_v22 = vld [vmem:[%s723_s1 + $0x20] sm:$0xff]  ;;  %v205_v24 = vld [vmem:[%s723_s1 + $0x10] sm:$0xff]  ;;  %v103_v36 = vadd.s32 4294967288, %v549_v3  ;;  %v159_v37 = vadd.s32 4294967256, %v549_v3  ;;  %v101_v44 = vsub.s32 %v549_v3, %v637_v35 }
   0x5   :  { %v44_v6 = vsel %vm24_vm0, %v559_v5, 0.0  ;;  %v43_v7 = vsel %vm24_vm0, %v544_v2, 0.0  ;;  %v48_v8 = vsel %vm24_vm0, %v554_v4, 0.0  ;;  %v47_v9 = vsel %vm24_vm0, %v539_v1, 0.0  ;;  %v210_v19 = vld [vmem:[%s723_s1 + $0x38] sm:$0xff]  ;;  %v204_v25 = vld [vmem:[%s723_s1 + $0x8] sm:$0xff] }
   0x6   :  { %35 = vadd.xlane.f32.xlu1 %v554_v4  ;;  %v49_v12 = vsel %vm24_vm0, %v579_v10, 0.0  ;;  %v45_v13 = vsel %vm24_vm0, %v584_v11, 0.0  ;;  %v50_v16 = vsel %vm24_vm0, %v597_v14, 0.0  ;;  %v46_v17 = vsel %vm24_vm0, %v602_v15, 0.0  ;;  %485 = vmatpush3.msra.mxu0 %v210_v19  ;;  %v206_v23 = vld [vmem:[%s723_s1 + $0x18] sm:$0xff]  ;;  %v203_v26 = vld [vmem:[%s723_s1] sm:$0xff] }
   0x7   :  { %27 = vadd.xlane.f32.xlu0 %v559_v5  ;;  %486 = vmatprep.subr.mxu0 %v514_v18  ;;  %v154_v38 = vadd.s32 4294967264, %v549_v3  ;;  %v110_v41 = vadd.s32 4294967280, %v549_v3  ;;  %v106_v42 = vsub.s32 %v103_v36, %v637_v35  ;;  %v162_v43 = vsub.s32 %v159_v37, %v637_v35 }
   0x8   :  { %487 = vmatpush3.msra.mxu0 %v209_v20  ;;  %v166_v48 = vadd.s32 4294967248, %v549_v3  ;;  %v117_v56 = vadd.s32 4294967272, %v549_v3  ;;  %v173_v57 = vadd.s32 4294967240, %v549_v3  ;;  %vm211_vm10 = vcmask 523264  }
   0x9   :  { %488 = vmatprep.subr.mxu0 %v514_v18  ;;  %v157_v46 = vsub.s32 %v154_v38, %v637_v35  ;;  %v113_v51 = vsub.s32 %v110_v41, %v637_v35  ;;  %vm291_vm11 = vcmask 1043456   ;;  %vm287_vm12 = vcmask 31744  }
   0xa   :  { %53 = vadd.xlane.f32.xlu1 %v44_v6  ;;  %489 = vmatpush3.msra.mxu0 %v208_v21  ;;  %v169_v0 = vsub.s32 %v166_v48, %v637_v35  ;;  %v176_v19 = vsub.s32 %v173_v57, %v637_v35 }
   0xb   :  { %51 = vadd.xlane.f32.xlu0 %v43_v7  ;;  %490 = vmatprep.subr.mxu0 %v514_v18 }
   0xc   :  { %491 = vmatpush3.msra.mxu0 %v207_v22 }
   0xd   :  { %492 = vmatprep.subr.mxu0 %v514_v18 }
   0xe   :  { %61 = vadd.xlane.f32.xlu1 %v48_v8  ;;  %493 = vmatpush3.msra.mxu0 %v206_v23 }
   0xf   :  { %59 = vadd.xlane.f32.xlu0 %v47_v9  ;;  %494 = vmatprep.subr.mxu0 %v514_v18 }
  0x10   :  { %495 = vmatpush3.msra.mxu0 %v205_v24 }
  0x11   :  { %496 = vmatprep.subr.mxu0 %v514_v18 }
  0x12   :  { %37 = vadd.xlane.f32.xlu1 %v579_v10  ;;  %497 = vmatpush3.msra.mxu0 %v204_v25 }
  0x13   :  { %29 = vadd.xlane.f32.xlu0 %v584_v11  ;;  %498 = vmatprep.subr.mxu0 %v514_v18  ;;  %v120_v18 = vsub.s32 %v117_v56, %v637_v35 }
  0x14   :  { %499 = vmatpush3.msra.mxu0 %v203_v26 }
  0x16   :  { %63 = vadd.xlane.f32.xlu1 %v49_v12 }
  0x17   :  { %55 = vadd.xlane.f32.xlu0 %v45_v13 }
  0x1a   :  { %39 = vadd.xlane.f32.xlu1 %v597_v14 }
  0x1b   :  { %31 = vadd.xlane.f32.xlu0 %v602_v15 }
  0x1e   :  { %65 = vadd.xlane.f32.xlu1 %v50_v16 }
  0x1f   :  { %57 = vadd.xlane.f32.xlu0 %v46_v17 }
  0x8b   :  { %v34_v27 = vpop.xlane.xlu1 %33 }
  0x8c   :  { %v26_v28 = vpop.xlane.xlu0 %25  ;;  %v79_v58 = vmul.f32 0.015625, %v34_v27 }
  0x8d   :  { %v75_v54 = vmul.f32 0.015625, %v26_v28 }
  0x8f   :  { %v36_v29 = vpop.xlane.xlu1 %35 }
  0x90   :  { %v28_v30 = vpop.xlane.xlu0 %27  ;;  %v80_v59 = vmul.f32 0.015625, %v36_v29 }
  0x91   :  { %v76_v55 = vmul.f32 0.015625, %v28_v30 }
  0x93   :  { %v54_v31 = vpop.xlane.xlu1 %53 }
  0x94   :  { %v52_v32 = vpop.xlane.xlu0 %51  ;;  %v68_v45 = vmul.f32 0.015625, %v54_v31 }
  0x95   :  { %v67_v47 = vmul.f32 0.015625, %v52_v32 }
  0x96   :  { %v84_v62 = vsub.f32 %v76_v55, %v68_v45  ;;  %v107_v16 = vrot.slane %v68_v45, %v106_v42 }
  0x97   :  { %v62_v33 = vpop.xlane.xlu1 %61  ;;  %v83_v63 = vsub.f32 %v75_v54, %v67_v47  ;;  %v102_v17 = vrot.slane %v67_v47, %v101_v44 }
  0x98   :  { %v60_v34 = vpop.xlane.xlu0 %59  ;;  %v72_v49 = vmul.f32 0.015625, %v62_v33  ;;  %v163_v24 = vrot.slane %v84_v62, %v162_v43 }
  0x99   :  { %v71_v50 = vmul.f32 0.015625, %v60_v34  ;;  %v158_v25 = vrot.slane %v83_v63, %v157_v46  ;;  %v109_v37 = vsel %vm108_vm2, %v107_v16, %v102_v17  ;;  %v392_v17 = vsub.s32 1, %v637_v35 }
  0x9a   :  { %v88_v6 = vsub.f32 %v80_v59, %v72_v49  ;;  %v131_v20 = vrot.slane %v72_v49, %v106_v42 }
  0x9b   :  { %v38_v39 = vpop.xlane.xlu1 %37  ;;  %v87_v7 = vsub.f32 %v79_v58, %v71_v50  ;;  %v127_v21 = vrot.slane %v71_v50, %v101_v44 }
  0x9c   :  { %v30_v40 = vpop.xlane.xlu0 %29  ;;  %v81_v8 = vmul.f32 0.015625, %v38_v39  ;;  %v187_v26 = vrot.slane %v88_v6, %v162_v43  ;;  %v165_v43 = vsel %vm164_vm3, %v163_v24, %v158_v25 }
  0x9d   :  { %v77_v9 = vmul.f32 0.015625, %v30_v40  ;;  %v183_v27 = vrot.slane %v87_v7, %v157_v46  ;;  %v132_v38 = vsel %vm108_vm2, %v131_v20, %v127_v21 }
  0x9f   :  { %v64_v52 = vpop.xlane.xlu1 %63  ;;  %v188_v46 = vsel %vm164_vm3, %v187_v26, %v183_v27 }
  0xa0   :  { %v56_v53 = vpop.xlane.xlu0 %55  ;;  %v73_v60 = vmul.f32 0.015625, %v64_v52 }
  0xa1   :  { %v69_v61 = vmul.f32 0.015625, %v56_v53 }
  0xa2   :  { %v89_v22 = vsub.f32 %v81_v8, %v73_v60  ;;  %v136_v28 = vrot.slane %v73_v60, %v113_v51  ;;  %v286_v60 = vld [vmem:[%s724_s2] sm:$0xf] }
  0xa3   :  { %v40_v12 = vpop.xlane.xlu1 %39  ;;  %v85_v23 = vsub.f32 %v77_v9, %v69_v61  ;;  %v114_v29 = vrot.slane %v69_v61, %v113_v51  ;;  %504 = vmatpush3.msk.msra.mxu1 %vm291_vm11, %v286_v60 }
  0xa4   :  { %v32_v13 = vpop.xlane.xlu0 %31  ;;  %v82_v32 = vmul.f32 0.015625, %v40_v12  ;;  %v192_v39 = vrot.slane %v89_v22, %v169_v0  ;;  %v137_v47 = vsel %vm115_vm4, %v136_v28, %v132_v38  ;;  %v373_v12 = vsub.s32 0, %v637_v35 }
  0xa5   :  { %v78_v33 = vmul.f32 0.015625, %v32_v13  ;;  %v170_v40 = vrot.slane %v85_v23, %v169_v0  ;;  %v116_v48 = vsel %vm115_vm4, %v114_v29, %v109_v37 }
  0xa6   :  { %v193_v53 = vsel %vm171_vm5, %v192_v39, %v188_v46 }
  0xa7   :  { %v66_v30 = vpop.xlane.xlu1 %65  ;;  %v172_v54 = vsel %vm171_vm5, %v170_v40, %v165_v43 }
  0xa8   :  { %v58_v31 = vpop.xlane.xlu0 %57  ;;  %v74_v34 = vmul.f32 0.015625, %v66_v30 }
  0xa9   :  { %v70_v36 = vmul.f32 0.015625, %v58_v31 }
  0xaa   :  { %v90_v41 = vsub.f32 %v82_v32, %v74_v34  ;;  %v141_v42 = vrot.slane %v74_v34, %v120_v18 }
  0xab   :  { %v86_v44 = vsub.f32 %v78_v33, %v70_v36  ;;  %v121_v45 = vrot.slane %v70_v36, %v120_v18 }
  0xac   :  { %v142_v49 = vsel %vm122_vm6, %v141_v42, %v137_v47  ;;  %v197_v50 = vrot.slane %v90_v41, %v176_v19 }
  0xad   :  { %v123_v51 = vsel %vm122_vm6, %v121_v45, %v116_v48  ;;  %v177_v52 = vrot.slane %v86_v44, %v176_v19 }
  0xae   :  { %v198_v56 = vsel %vm178_vm8, %v197_v50, %v193_v53  ;;  %v144_v57 = vsel %vm143_vm7, %v142_v49, %v123_v51 }
  0xaf   :  { %v179_v55 = vsel %vm178_vm8, %v177_v52, %v172_v54 }
  0xb0   :  { %v199_v58 = vsel %vm143_vm7, %v198_v56, %v179_v55 }
  0xb1   :  { %v202_v59 = vsel %vm201_vm9, %v144_v57, %v199_v58 }
  0xb2   :  { %501 = vmatmul.mubr.msk.f32.vlgmr.msra.gmra.mxu0 %vm211_vm10, %v202_v59 }
 0x172   :  { %v281_v61 = vpop.f32.mrf.mxu0 }
 0x173   :  { %v285_v62 = vmax.f32 %v281_v61, 0.0 }
 0x174   :  { %v502_v63 = vpop.f32.mrf.mxu0 }
 0x175   :  { %506 = vmatmul.mubr.msk.f32.vlgmr.msra.gmra.mxu1 %vm287_vm12, %v285_v62 }
 0x235   :  { %v361_v0 = vpop.f32.mrf.mxu1 }
 0x236   :  { %v472_v6 = vmul.f32 -1.442695, %v361_v0 }
 0x237   :  { %v507_v7 = vpop.f32.mrf.mxu1 }
 0x238   :  { %510 = vpow2.f32 %v472_v6 }
 0x245   :  { %v511_v8 = vpop.eup %510 }
 0x246   :  { %v368_v9 = vadd.f32 1.0, %v511_v8 }
 0x248   :  { %512 = vrcp.f32 %v368_v9 }
 0x255   :  { %v513_v13 = vpop.eup %512 }
 0x256   :  { %v374_v16 = vrot.slane %v513_v13, %v373_v12  ;;  %v393_v18 = vrot.slane %v513_v13, %v392_v17 }
 0x258   :  { %380 = vbcast.lane.b32.xlu1 %v374_v16, 264  ;;  %376 = vbcast.lane.b32.xlu0 %v374_v16, 256 }
 0x25c   :  { %384 = vbcast.lane.b32.xlu1 %v374_v16, 272  ;;  %395 = vbcast.lane.b32.xlu0 %v393_v18, 256 }
 0x260   :  { %388 = vbcast.lane.b32.xlu1 %v374_v16, 280  ;;  %403 = vbcast.lane.b32.xlu0 %v393_v18, 272 }
 0x264   :  { %399 = vbcast.lane.b32.xlu1 %v393_v18, 264  ;;  %411 = vbcast.lane.b32.xlu0 %v374_v16, 288 }
 0x268   :  { %407 = vbcast.lane.b32.xlu1 %v393_v18, 280  ;;  %419 = vbcast.lane.b32.xlu0 %v374_v16, 304 }
 0x26c   :  { %415 = vbcast.lane.b32.xlu1 %v374_v16, 296  ;;  %427 = vbcast.lane.b32.xlu0 %v393_v18, 288 }
 0x270   :  { %423 = vbcast.lane.b32.xlu1 %v374_v16, 312  ;;  %435 = vbcast.lane.b32.xlu0 %v393_v18, 304 }
 0x274   :  { %431 = vbcast.lane.b32.xlu1 %v393_v18, 296 }
 0x278   :  { %439 = vbcast.lane.b32.xlu1 %v393_v18, 312 }
 0x2ca   :  { %v381_v19 = vpop.permute.xlu1 %380  ;;  %v377_v20 = vpop.permute.xlu0 %376 }
 0x2ce   :  { %v385_v35 = vpop.permute.xlu1 %384  ;;  %v396_v21 = vpop.permute.xlu0 %395 }
 0x2d2   :  { %v389_v22 = vpop.permute.xlu1 %388  ;;  %v404_v23 = vpop.permute.xlu0 %403 }
 0x2d6   :  { %v400_v24 = vpop.permute.xlu1 %399  ;;  %v412_v25 = vpop.permute.xlu0 %411 }
 0x2d7   :  { %v441_v26 = vsel %vm24_vm0, %v377_v20, %v412_v25 }
 0x2d8   :  { %v449_v27 = vmul.f32 %v441_v26, %v544_v2 }
 0x2da   :  { %457 = vst [vmem:[%s725_s3] sm:$0xff] %v449_v27  ;;  %v408_v28 = vpop.permute.xlu1 %407  ;;  %v420_v29 = vpop.permute.xlu0 %419 }
 0x2db   :  { %v443_v30 = vsel %vm24_vm0, %v385_v35, %v420_v29 }
 0x2dc   :  { %v451_v31 = vmul.f32 %v443_v30, %v584_v11 }
 0x2de   :  { %459 = vst [vmem:[%s725_s3 + $0x10] sm:$0xff] %v451_v31  ;;  %v416_v32 = vpop.permute.xlu1 %415  ;;  %v428_v33 = vpop.permute.xlu0 %427 }
 0x2df   :  { %v442_v2 = vsel %vm24_vm0, %v381_v19, %v416_v32  ;;  %v445_v34 = vsel %vm24_vm0, %v396_v21, %v428_v33 }
 0x2e0   :  { %v450_v36 = vmul.f32 %v442_v2, %v559_v5  ;;  %v453_v37 = vmul.f32 %v445_v34, %v539_v1 }
 0x2e2   :  { %458 = vst [vmem:[%s725_s3 + $0x8] sm:$0xff] %v450_v36  ;;  %461 = vst [vmem:[%s725_s3 + $0x20] sm:$0xff] %v453_v37  ;;  %v424_v11 = vpop.permute.xlu1 %423  ;;  %v436_v38 = vpop.permute.xlu0 %435 }
 0x2e3   :  { %v444_v39 = vsel %vm24_vm0, %v389_v22, %v424_v11  ;;  %v447_v40 = vsel %vm24_vm0, %v404_v23, %v436_v38 }
 0x2e4   :  { %v452_v5 = vmul.f32 %v444_v39, %v602_v15  ;;  %v455_v1 = vmul.f32 %v447_v40, %v579_v10 }
 0x2e6   :  { %460 = vst [vmem:[%s725_s3 + $0x18] sm:$0xff] %v452_v5  ;;  %463 = vst [vmem:[%s725_s3 + $0x30] sm:$0xff] %v455_v1  ;;  %v432_v41 = vpop.permute.xlu1 %431 }
 0x2e7   :  { %v446_v42 = vsel %vm24_vm0, %v400_v24, %v432_v41 }
 0x2e8   :  { %v454_v44 = vmul.f32 %v446_v42, %v554_v4 }
 0x2ea   :  { %462 = vst [vmem:[%s725_s3 + $0x28] sm:$0xff] %v454_v44  ;;  %v440_v15 = vpop.permute.xlu1 %439 }
 0x2eb   :  { %v448_v10 = vsel %vm24_vm0, %v408_v28, %v440_v15 }
 0x2ec   :  { %v456_v45 = vmul.f32 %v448_v10, %v597_v14 }
 0x2ee   :  { %464 = vst [vmem:[%s725_s3 + $0x38] sm:$0xff] %v456_v45 }

</bundles_post_ra>
